<compile_context>
chip_gen: v6e
topology: v6e:2x2x1
jax: 0.10.0
libtpu: 0.0.40
codegen_flags: <defaults>
</compile_context>

<pallas_src>
import functools

import jax
import jax.numpy as jnp
from jax import lax
from jax.experimental import pallas as pl
from jax.experimental.pallas import tpu as pltpu


def bottleneck_kernel(x_ref, w1_ref, b1_ref, w2_ref, b2_ref, w3_ref, b3_ref,
                      mask_ref, out_ref, tap_ref, *, img_w, taps_per_group):
    """One image per grid step.  Activations are (channels, H*W)."""
    cdt = w1_ref.dtype                      # matmul compute dtype (bf16 or f32)
    P = w1_ref.shape[0]                     # planes
    G = taps_per_group
    x = x_ref[...]                          # (Cin, HW), io dtype
    HW = x.shape[1]

    # ---- conv1 (1x1) + BN1 (scale folded into w1) + ReLU --------------------
    h1 = jnp.dot(w1_ref[...], x.astype(cdt),
                 preferred_element_type=jnp.float32)              # (P, HW) f32
    h1 = jnp.maximum(h1 + b1_ref[...], 0.0)

    # ---- conv2 (3x3, stride 1, pad 1) + BN2 + ReLU --------------------------
    # Center tap (dy,dx)=(0,0) is fed straight into the accumulator (no
    # staging, no roll, no mask).  The 8 side taps are produced with lane
    # rolls + boundary masks, staged G at a time into a compute-dtype scratch,
    # and accumulated with one (P, G*P) x (G*P, HW) matmul per group.
    mask = mask_ref[...]                    # (8, HW) f32 validity per side tap
    h2 = jnp.dot(w2_ref[:, 0:P], h1.astype(cdt),
                 preferred_element_type=jnp.float32)              # (P, HW) f32

    side = [k for k in range(9) if k != 4]  # must match the wrapper's order
    n_groups = len(side) // G
    for g in range(n_groups):
        for j in range(G):
            idx = g * G + j
            k = side[idx]
            dy, dx = k // 3 - 1, k % 3 - 1
            off = dy * img_w + dx
            shift = (-off) % HW             # tap[:, i] = h1[:, i + off]
            tap = pltpu.roll(h1, shift, 1) * mask[idx:idx + 1, :]
            # Store in the compute dtype (halves vst bytes + scratch size).
            tap_ref[j * P:(j + 1) * P, :] = tap.astype(cdt)
        lo = (1 + g * G) * P
        hi = (1 + (g + 1) * G) * P
        h2 += jnp.dot(w2_ref[:, lo:hi], tap_ref[...],
                      preferred_element_type=jnp.float32)
    h2 = jnp.maximum(h2 + b2_ref[...], 0.0)

    # ---- conv3 (1x1) + BN3 ---------------------------------------------------
    h3 = jnp.dot(w3_ref[...], h2.astype(cdt),
                 preferred_element_type=jnp.float32)              # (Cout, HW)
    h3 = h3 + b3_ref[...]

    # ---- residual add (downsample is None -> residual = x) + ReLU -----------
    out_ref[...] = jnp.maximum(h3 + x.astype(jnp.float32), 0.0).astype(out_ref.dtype)


def bottleneck_forward(x_nchw, params, *, compute_dtype=jnp.bfloat16,
                       io_dtype=None, taps_per_group=4, eps=1e-5):
    """x_nchw: (N, Cin, H, W) -> (N, Cout, H, W) in io_dtype.

    params = ((w1, bn1), (w2, bn2), (w3, bn3)) with PyTorch-layout OIHW conv
    weights and bn = (gamma, beta, running_mean, running_var).
    compute_dtype: MXU dtype (bf16 default; f32 accumulation regardless).
    io_dtype: activation HBM dtype (defaults to compute_dtype) — bf16 halves
    DMA bytes for this DMA-bound kernel.
    taps_per_group: side taps staged per MXU push (8 % G == 0); G=4 -> K=4*P
    matches the v6e/v7x 256-deep MXU at P=64, use G=2 on v5e.
    """
    if io_dtype is None:
        io_dtype = compute_dtype
    (w1, bn1), (w2, bn2), (w3, bn3) = params
    N, Cin, H, W = x_nchw.shape
    HW = H * W
    P = w1.shape[0]                 # planes
    Cout = w3.shape[0]              # planes * 4
    assert Cin == Cout, "Bottleneck with downsample=None needs inplanes == 4*planes"
    assert P % 8 == 0, "planes must be a multiple of 8 (sublane tile alignment)"
    assert 8 % taps_per_group == 0, "taps_per_group must divide 8"
    G = taps_per_group

    def fold(bn):
        gamma, beta, mean, var = bn
        scale = gamma / jnp.sqrt(var + eps)
        return scale, beta - mean * scale

    s1, b1 = fold(bn1)
    s2, b2 = fold(bn2)
    s3, b3 = fold(bn3)

    # BN scales folded into the conv weights; per-channel biases kept as
    # (C, 1) f32 vectors (lane-broadcast inside the kernel).
    center = 4
    side = [k for k in range(9) if k != center]
    tap_order = [center] + side            # center tap first, then side taps
    w1k = (w1[:, :, 0, 0] * s1[:, None]).astype(compute_dtype)           # (P, Cin)
    w2t = jnp.transpose(w2, (0, 2, 3, 1)).reshape(P, 9, P)
    w2t = jnp.take(w2t, jnp.array(tap_order), axis=1)                    # reorder taps
    w2k = (w2t.reshape(P, 9 * P) * s2[:, None]).astype(compute_dtype)    # (P, 9P)
    w3k = (w3[:, :, 0, 0] * s3[:, None]).astype(compute_dtype)           # (Cout, P)
    b1k = b1[:, None].astype(jnp.float32)                                # (P, 1)
    b2k = b2[:, None].astype(jnp.float32)                                # (P, 1)
    b3k = b3[:, None].astype(jnp.float32)                                # (Cout, 1)

    # 0/1 validity mask per side tap (implements the 3x3 conv's zero padding).
    ys, xs = jnp.divmod(jnp.arange(HW, dtype=jnp.int32), W)
    rows = []
    for k in side:
        dy, dx = k // 3 - 1, k % 3 - 1
        valid = ((ys + dy >= 0) & (ys + dy < H) &
                 (xs + dx >= 0) & (xs + dx < W))
        rows.append(valid.astype(jnp.float32))
    mask = jnp.stack(rows)                                               # (8, HW)

    # Free reshape: channels on sublanes, H*W on the 128-lane axis.
    # Casting to io_dtype (bf16 by default) halves input DMA bytes.
    x = x_nchw.reshape(N, Cin, HW).astype(io_dtype)

    # VMEM live-set estimate -> explicit limit (double-buffered I/O blocks +
    # weights + masks + tap scratch + f32 intermediates), with 2x headroom,
    # clamped to exceed v5e's 16 MiB scoped default and fit v7x's 64 MiB/TC.
    io_sz = jnp.dtype(io_dtype).itemsize
    c_sz = jnp.dtype(compute_dtype).itemsize
    vmem_est = (2 * Cin * HW * io_sz + 2 * Cout * HW * io_sz
                + 2 * 8 * HW * 4
                + 2 * (P * Cin + 9 * P * P + Cout * P) * c_sz
                + 2 * (2 * P + Cout) * 4
                + G * P * HW * c_sz
                + (3 * P + 2 * Cout) * HW * 4)
    vmem_limit = int(min(max(2 * vmem_est, 32 * 1024 * 1024), 56 * 1024 * 1024))

    full2 = lambda n: (0, 0)

    out = pl.pallas_call(
        functools.partial(bottleneck_kernel, img_w=W, taps_per_group=G),
        out_shape=jax.ShapeDtypeStruct((N, Cout, HW), io_dtype),
        grid_spec=pltpu.PrefetchScalarGridSpec(
            num_scalar_prefetch=0,
            grid=(N,),
            in_specs=[
                pl.BlockSpec((None, Cin, HW), lambda n: (n, 0, 0)),  # x (batch squeezed)
                pl.BlockSpec((P, Cin), full2),        # conv1 weight * bn1 scale
                pl.BlockSpec((P, 1), full2),          # bn1 folded bias
                pl.BlockSpec((P, 9 * P), full2),      # conv2 weight * bn2 scale (tap-reordered)
                pl.BlockSpec((P, 1), full2),          # bn2 folded bias
                pl.BlockSpec((Cout, P), full2),       # conv3 weight * bn3 scale
                pl.BlockSpec((Cout, 1), full2),       # bn3 folded bias
                pl.BlockSpec((8, HW), full2),         # side-tap boundary masks
            ],
            out_specs=pl.BlockSpec((None, Cout, HW), lambda n: (n, 0, 0)),
            scratch_shapes=[pltpu.VMEM((G * P, HW), compute_dtype)],
        ),
        # Batch axis is fully independent -> shard across TensorCores on v7x.
        # (Keep the batch per call >= 2 and preferably even on v7x.)
        compiler_params=pltpu.CompilerParams(
            dimension_semantics=("parallel",),
            vmem_limit_bytes=vmem_limit),
    )(x, w1k, b1k, w2k, b2k, w3k, b3k, mask)

    return out.reshape(N, Cout, H, W)


def make_params(key, inplanes, planes):
    """PyTorch-layout params: OIHW conv weights, BN = (gamma, beta, mean, var)."""
    cout = planes * 4
    ks = jax.random.split(key, 15)
    w1 = 0.1 * jax.random.normal(ks[0], (planes, inplanes, 1, 1), jnp.float32)
    w2 = 0.1 * jax.random.normal(ks[1], (planes, planes, 3, 3), jnp.float32)
    w3 = 0.1 * jax.random.normal(ks[2], (cout, planes, 1, 1), jnp.float32)

    def bn(kg, kb, km, kv, c):
        gamma = 1.0 + 0.1 * jax.random.normal(kg, (c,), jnp.float32)
        beta = 0.1 * jax.random.normal(kb, (c,), jnp.float32)
        mean = 0.1 * jax.random.normal(km, (c,), jnp.float32)
        var = 1.0 + 0.1 * jnp.abs(jax.random.normal(kv, (c,), jnp.float32))
        return (gamma, beta, mean, var)

    bn1 = bn(ks[3], ks[4], ks[5], ks[6], planes)
    bn2 = bn(ks[7], ks[8], ks[9], ks[10], planes)
    bn3 = bn(ks[11], ks[12], ks[13], ks[14], cout)
    return ((w1, bn1), (w2, bn2), (w3, bn3))


def ref_forward(x_nchw, params, eps=1e-5):
    """Pure-JAX reference (inference-mode BN), NCHW in/out."""
    (w1, bn1), (w2, bn2), (w3, bn3) = params
    dn = ('NCHW', 'OIHW', 'NCHW')

    def bn(h, p):
        gamma, beta, mean, var = p
        inv = (gamma / jnp.sqrt(var + eps))[None, :, None, None]
        return (h - mean[None, :, None, None]) * inv + beta[None, :, None, None]

    h = lax.conv_general_dilated(x_nchw, w1, (1, 1), 'VALID', dimension_numbers=dn)
    h = jnp.maximum(bn(h, bn1), 0.0)
    h = lax.conv_general_dilated(h, w2, (1, 1), ((1, 1), (1, 1)), dimension_numbers=dn)
    h = jnp.maximum(bn(h, bn2), 0.0)
    h = lax.conv_general_dilated(h, w3, (1, 1), 'VALID', dimension_numbers=dn)
    h = bn(h, bn3)
    return jnp.maximum(h + x_nchw, 0.0)


if __name__ == "__main__":
    key = jax.random.PRNGKey(0)
    k_x, k_p = jax.random.split(key)

    # Bottleneck(inplanes=32, planes=8, stride=1, downsample=None)
    # (planes kept a multiple of 8 so scratch row offsets stay tile-aligned)
    N, planes, H, W = 2, 8, 16, 16
    inplanes = planes * 4
    x = jax.random.normal(k_x, (N, inplanes, H, W), jnp.float32)   # NCHW input
    params = make_params(k_p, inplanes, planes)

    ref = ref_forward(x, params)

    # f32 compute / f32 I/O path — tight correctness check.
    out32 = jax.block_until_ready(
        bottleneck_forward(x, params, compute_dtype=jnp.float32))
    assert out32.shape == (N, planes * 4, H, W)
    err32 = jnp.max(jnp.abs(out32.astype(jnp.float32) - ref))
    assert jnp.allclose(out32.astype(jnp.float32), ref, atol=1e-3, rtol=1e-3), \
        f"f32 max abs err {err32}"

    # Default path: bf16 compute + bf16 activation I/O (f32 accumulation).
    out16 = jax.block_until_ready(bottleneck_forward(x, params))
    err16 = jnp.max(jnp.abs(out16.astype(jnp.float32) - ref))
    assert jnp.allclose(out16.astype(jnp.float32), ref, atol=2e-1, rtol=2e-1), \
        f"bf16 max abs err {err16}"

    print("KERNEL_OK")
</pallas_src>

<mosaic_0001>
module attributes {stable_mosaic.version = 11 : i64} {
  func.func @bottleneck_kernel(%arg0: i32, %arg1: memref<1x32x256xf32, #tpu.memory_space<vmem>>, %arg2: memref<8x32xf32, #tpu.memory_space<vmem>>, %arg3: memref<8x1xf32, #tpu.memory_space<vmem>>, %arg4: memref<8x72xf32, #tpu.memory_space<vmem>>, %arg5: memref<8x1xf32, #tpu.memory_space<vmem>>, %arg6: memref<32x8xf32, #tpu.memory_space<vmem>>, %arg7: memref<32x1xf32, #tpu.memory_space<vmem>>, %arg8: memref<8x256xf32, #tpu.memory_space<vmem>>, %arg9: memref<1x32x256xf32, #tpu.memory_space<vmem>>, %arg10: memref<32x256xf32, #tpu.memory_space<vmem>>) attributes {dimension_semantics = [#tpu.dimension_semantics<parallel>], iteration_bounds = array<i64: 2>, scalar_prefetch = 0 : i64, scratch_operands = 1 : i64, tpu.core_type = #tpu.core_type<tc>, window_params = [{transform_indices = @transform_0, window_bounds = array<i64: 1, 32, 256>}, {pipeline_mode = #tpu.pipeline_mode<synchronous>, transform_indices = @transform_1, window_bounds = array<i64: 8, 32>}, {pipeline_mode = #tpu.pipeline_mode<synchronous>, transform_indices = @transform_2, window_bounds = array<i64: 8, 1>}, {pipeline_mode = #tpu.pipeline_mode<synchronous>, transform_indices = @transform_3, window_bounds = array<i64: 8, 72>}, {pipeline_mode = #tpu.pipeline_mode<synchronous>, transform_indices = @transform_4, window_bounds = array<i64: 8, 1>}, {pipeline_mode = #tpu.pipeline_mode<synchronous>, transform_indices = @transform_5, window_bounds = array<i64: 32, 8>}, {pipeline_mode = #tpu.pipeline_mode<synchronous>, transform_indices = @transform_6, window_bounds = array<i64: 32, 1>}, {pipeline_mode = #tpu.pipeline_mode<synchronous>, transform_indices = @transform_7, window_bounds = array<i64: 8, 256>}, {transform_indices = @transform_8, window_bounds = array<i64: 1, 32, 256>}]} {
    %c0 = arith.constant 0 : index
    %c0_0 = arith.constant 0 : index
    %c0_1 = arith.constant 0 : index
    %0 = vector.load %arg1[%c0, %c0_0, %c0_1] : memref<1x32x256xf32, #tpu.memory_space<vmem>>, vector<1x32x256xf32>
    %1 = vector.shape_cast %0 : vector<1x32x256xf32> to vector<32x256xf32>
    %c0_2 = arith.constant 0 : index
    %c0_3 = arith.constant 0 : index
    %2 = vector.load %arg2[%c0_2, %c0_3] : memref<8x32xf32, #tpu.memory_space<vmem>>, vector<8x32xf32>
    %cst = arith.constant dense<0.000000e+00> : vector<8x256xf32>
    %3 = tpu.matmul %2, %1, %cst {dimension_numbers = #tpu.dot_dimension_numbers<[1], [0], [0], [1], [0, 0, 1, 1], [], []>} : vector<8x32xf32>, vector<32x256xf32>, vector<8x256xf32> -> vector<8x256xf32>
    %c0_4 = arith.constant 0 : index
    %c0_5 = arith.constant 0 : index
    %4 = vector.load %arg3[%c0_4, %c0_5] : memref<8x1xf32, #tpu.memory_space<vmem>>, vector<8x1xf32>
    %5 = vector.broadcast %4 : vector<8x1xf32> to vector<8x256xf32>
    %6 = arith.addf %3, %5 : vector<8x256xf32>
    %cst_6 = arith.constant 0.000000e+00 : f32
    %7 = vector.broadcast %cst_6 : f32 to vector<8x256xf32>
    %8 = arith.maximumf %6, %7 : vector<8x256xf32>
    %c0_7 = arith.constant 0 : index
    %c0_8 = arith.constant 0 : index
    %9 = vector.load %arg8[%c0_7, %c0_8] : memref<8x256xf32, #tpu.memory_space<vmem>>, vector<8x256xf32>
    %c0_9 = arith.constant 0 : index
    %c0_10 = arith.constant 0 : index
    %10 = vector.load %arg4[%c0_9, %c0_10] : memref<8x72xf32, #tpu.memory_space<vmem>>, vector<8x8xf32>
    %cst_11 = arith.constant dense<0.000000e+00> : vector<8x256xf32>
    %11 = tpu.matmul %10, %8, %cst_11 {dimension_numbers = #tpu.dot_dimension_numbers<[1], [0], [0], [1], [0, 0, 1, 1], [], []>} : vector<8x8xf32>, vector<8x256xf32>, vector<8x256xf32> -> vector<8x256xf32>
    %c17_i32 = arith.constant 17 : i32
    %12 = tpu.dynamic_rotate %8 by %c17_i32 dim 1 : vector<8x256xf32>, i32 -> vector<8x256xf32>
    %13 = vector.extract_strided_slice %9 {offsets = [0, 0], sizes = [1, 256], strides = [1, 1]} : vector<8x256xf32> to vector<1x256xf32>
    %14 = vector.broadcast %13 : vector<1x256xf32> to vector<8x256xf32>
    %15 = arith.mulf %12, %14 : vector<8x256xf32>
    %c0_12 = arith.constant 0 : index
    %c0_13 = arith.constant 0 : index
    %16 = vector.load %arg10[%c0_12, %c0_13] : memref<32x256xf32, #tpu.memory_space<vmem>>, vector<8x256xf32>
    tpu.vector_store %arg10[%c0_12, %c0_13], %15 {strides = array<i32>} : memref<32x256xf32, #tpu.memory_space<vmem>>, vector<8x256xf32>,
    %c16_i32 = arith.constant 16 : i32
    %17 = tpu.dynamic_rotate %8 by %c16_i32 dim 1 : vector<8x256xf32>, i32 -> vector<8x256xf32>
    %18 = vector.extract_strided_slice %9 {offsets = [1, 0], sizes = [1, 256], strides = [1, 1]} : vector<8x256xf32> to vector<1x256xf32>
    %19 = vector.broadcast %18 : vector<1x256xf32> to vector<8x256xf32>
    %20 = arith.mulf %17, %19 : vector<8x256xf32>
    %c8 = arith.constant 8 : index
    %c0_14 = arith.constant 0 : index
    %21 = vector.load %arg10[%c8, %c0_14] : memref<32x256xf32, #tpu.memory_space<vmem>>, vector<8x256xf32>
    tpu.vector_store %arg10[%c8, %c0_14], %20 {strides = array<i32>} : memref<32x256xf32, #tpu.memory_space<vmem>>, vector<8x256xf32>,
    %c15_i32 = arith.constant 15 : i32
    %22 = tpu.dynamic_rotate %8 by %c15_i32 dim 1 : vector<8x256xf32>, i32 -> vector<8x256xf32>
    %23 = vector.extract_strided_slice %9 {offsets = [2, 0], sizes = [1, 256], strides = [1, 1]} : vector<8x256xf32> to vector<1x256xf32>
    %24 = vector.broadcast %23 : vector<1x256xf32> to vector<8x256xf32>
    %25 = arith.mulf %22, %24 : vector<8x256xf32>
    %c16 = arith.constant 16 : index
    %c0_15 = arith.constant 0 : index
    %26 = vector.load %arg10[%c16, %c0_15] : memref<32x256xf32, #tpu.memory_space<vmem>>, vector<8x256xf32>
    tpu.vector_store %arg10[%c16, %c0_15], %25 {strides = array<i32>} : memref<32x256xf32, #tpu.memory_space<vmem>>, vector<8x256xf32>,
    %c1_i32 = arith.constant 1 : i32
    %27 = tpu.dynamic_rotate %8 by %c1_i32 dim 1 : vector<8x256xf32>, i32 -> vector<8x256xf32>
    %28 = vector.extract_strided_slice %9 {offsets = [3, 0], sizes = [1, 256], strides = [1, 1]} : vector<8x256xf32> to vector<1x256xf32>
    %29 = vector.broadcast %28 : vector<1x256xf32> to vector<8x256xf32>
    %30 = arith.mulf %27, %29 : vector<8x256xf32>
    %c24 = arith.constant 24 : index
    %c0_16 = arith.constant 0 : index
    %31 = vector.load %arg10[%c24, %c0_16] : memref<32x256xf32, #tpu.memory_space<vmem>>, vector<8x256xf32>
    tpu.vector_store %arg10[%c24, %c0_16], %30 {strides = array<i32>} : memref<32x256xf32, #tpu.memory_space<vmem>>, vector<8x256xf32>,
    %c0_17 = arith.constant 0 : index
    %c8_18 = arith.constant 8 : index
    %32 = vector.load %arg4[%c0_17, %c8_18] : memref<8x72xf32, #tpu.memory_space<vmem>>, vector<8x32xf32>
    %c0_19 = arith.constant 0 : index
    %c0_20 = arith.constant 0 : index
    %33 = vector.load %arg10[%c0_19, %c0_20] : memref<32x256xf32, #tpu.memory_space<vmem>>, vector<32x256xf32>
    %cst_21 = arith.constant dense<0.000000e+00> : vector<8x256xf32>
    %34 = tpu.matmul %32, %33, %cst_21 {dimension_numbers = #tpu.dot_dimension_numbers<[1], [0], [0], [1], [0, 0, 1, 1], [], []>} : vector<8x32xf32>, vector<32x256xf32>, vector<8x256xf32> -> vector<8x256xf32>
    %35 = arith.addf %11, %34 : vector<8x256xf32>
    %c255_i32 = arith.constant 255 : i32
    %36 = tpu.dynamic_rotate %8 by %c255_i32 dim 1 : vector<8x256xf32>, i32 -> vector<8x256xf32>
    %37 = vector.extract_strided_slice %9 {offsets = [4, 0], sizes = [1, 256], strides = [1, 1]} : vector<8x256xf32> to vector<1x256xf32>
    %38 = vector.broadcast %37 : vector<1x256xf32> to vector<8x256xf32>
    %39 = arith.mulf %36, %38 : vector<8x256xf32>
    %c0_22 = arith.constant 0 : index
    %c0_23 = arith.constant 0 : index
    %40 = vector.load %arg10[%c0_22, %c0_23] : memref<32x256xf32, #tpu.memory_space<vmem>>, vector<8x256xf32>
    tpu.vector_store %arg10[%c0_22, %c0_23], %39 {strides = array<i32>} : memref<32x256xf32, #tpu.memory_space<vmem>>, vector<8x256xf32>,
    %c241_i32 = arith.constant 241 : i32
    %41 = tpu.dynamic_rotate %8 by %c241_i32 dim 1 : vector<8x256xf32>, i32 -> vector<8x256xf32>
    %42 = vector.extract_strided_slice %9 {offsets = [5, 0], sizes = [1, 256], strides = [1, 1]} : vector<8x256xf32> to vector<1x256xf32>
    %43 = vector.broadcast %42 : vector<1x256xf32> to vector<8x256xf32>
    %44 = arith.mulf %41, %43 : vector<8x256xf32>
    %c8_24 = arith.constant 8 : index
    %c0_25 = arith.constant 0 : index
    %45 = vector.load %arg10[%c8_24, %c0_25] : memref<32x256xf32, #tpu.memory_space<vmem>>, vector<8x256xf32>
    tpu.vector_store %arg10[%c8_24, %c0_25], %44 {strides = array<i32>} : memref<32x256xf32, #tpu.memory_space<vmem>>, vector<8x256xf32>,
    %c240_i32 = arith.constant 240 : i32
    %46 = tpu.dynamic_rotate %8 by %c240_i32 dim 1 : vector<8x256xf32>, i32 -> vector<8x256xf32>
    %47 = vector.extract_strided_slice %9 {offsets = [6, 0], sizes = [1, 256], strides = [1, 1]} : vector<8x256xf32> to vector<1x256xf32>
    %48 = vector.broadcast %47 : vector<1x256xf32> to vector<8x256xf32>
    %49 = arith.mulf %46, %48 : vector<8x256xf32>
    %c16_26 = arith.constant 16 : index
    %c0_27 = arith.constant 0 : index
    %50 = vector.load %arg10[%c16_26, %c0_27] : memref<32x256xf32, #tpu.memory_space<vmem>>, vector<8x256xf32>
    tpu.vector_store %arg10[%c16_26, %c0_27], %49 {strides = array<i32>} : memref<32x256xf32, #tpu.memory_space<vmem>>, vector<8x256xf32>,
    %c239_i32 = arith.constant 239 : i32
    %51 = tpu.dynamic_rotate %8 by %c239_i32 dim 1 : vector<8x256xf32>, i32 -> vector<8x256xf32>
    %52 = vector.extract_strided_slice %9 {offsets = [7, 0], sizes = [1, 256], strides = [1, 1]} : vector<8x256xf32> to vector<1x256xf32>
    %53 = vector.broadcast %52 : vector<1x256xf32> to vector<8x256xf32>
    %54 = arith.mulf %51, %53 : vector<8x256xf32>
    %c24_28 = arith.constant 24 : index
    %c0_29 = arith.constant 0 : index
    %55 = vector.load %arg10[%c24_28, %c0_29] : memref<32x256xf32, #tpu.memory_space<vmem>>, vector<8x256xf32>
    tpu.vector_store %arg10[%c24_28, %c0_29], %54 {strides = array<i32>} : memref<32x256xf32, #tpu.memory_space<vmem>>, vector<8x256xf32>,
    %c0_30 = arith.constant 0 : index
    %c40 = arith.constant 40 : index
    %56 = vector.load %arg4[%c0_30, %c40] : memref<8x72xf32, #tpu.memory_space<vmem>>, vector<8x32xf32>
    %c0_31 = arith.constant 0 : index
    %c0_32 = arith.constant 0 : index
    %57 = vector.load %arg10[%c0_31, %c0_32] : memref<32x256xf32, #tpu.memory_space<vmem>>, vector<32x256xf32>
    %cst_33 = arith.constant dense<0.000000e+00> : vector<8x256xf32>
    %58 = tpu.matmul %56, %57, %cst_33 {dimension_numbers = #tpu.dot_dimension_numbers<[1], [0], [0], [1], [0, 0, 1, 1], [], []>} : vector<8x32xf32>, vector<32x256xf32>, vector<8x256xf32> -> vector<8x256xf32>
    %59 = arith.addf %35, %58 : vector<8x256xf32>
    %c0_34 = arith.constant 0 : index
    %c0_35 = arith.constant 0 : index
    %60 = vector.load %arg5[%c0_34, %c0_35] : memref<8x1xf32, #tpu.memory_space<vmem>>, vector<8x1xf32>
    %61 = vector.broadcast %60 : vector<8x1xf32> to vector<8x256xf32>
    %62 = arith.addf %59, %61 : vector<8x256xf32>
    %cst_36 = arith.constant 0.000000e+00 : f32
    %63 = vector.broadcast %cst_36 : f32 to vector<8x256xf32>
    %64 = arith.maximumf %62, %63 : vector<8x256xf32>
    %c0_37 = arith.constant 0 : index
    %c0_38 = arith.constant 0 : index
    %65 = vector.load %arg6[%c0_37, %c0_38] : memref<32x8xf32, #tpu.memory_space<vmem>>, vector<32x8xf32>
    %cst_39 = arith.constant dense<0.000000e+00> : vector<32x256xf32>
    %66 = tpu.matmul %65, %64, %cst_39 {dimension_numbers = #tpu.dot_dimension_numbers<[1], [0], [0], [1], [0, 0, 1, 1], [], []>} : vector<32x8xf32>, vector<8x256xf32>, vector<32x256xf32> -> vector<32x256xf32>
    %c0_40 = arith.constant 0 : index
    %c0_41 = arith.constant 0 : index
    %67 = vector.load %arg7[%c0_40, %c0_41] : memref<32x1xf32, #tpu.memory_space<vmem>>, vector<32x1xf32>
    %68 = vector.broadcast %67 : vector<32x1xf32> to vector<32x256xf32>
    %69 = arith.addf %66, %68 : vector<32x256xf32>
    %70 = arith.addf %69, %1 : vector<32x256xf32>
    %cst_42 = arith.constant 0.000000e+00 : f32
    %71 = vector.broadcast %cst_42 : f32 to vector<32x256xf32>
    %72 = arith.maximumf %70, %71 : vector<32x256xf32>
    %c0_43 = arith.constant 0 : index
    %c0_44 = arith.constant 0 : index
    %c0_45 = arith.constant 0 : index
    %73 = vector.load %arg9[%c0_43, %c0_44, %c0_45] : memref<1x32x256xf32, #tpu.memory_space<vmem>>, vector<1x32x256xf32>
    %74 = vector.shape_cast %73 : vector<1x32x256xf32> to vector<32x256xf32>
    %75 = vector.shape_cast %72 : vector<32x256xf32> to vector<1x32x256xf32>
    tpu.vector_store %arg9[%c0_43, %c0_44, %c0_45], %75 {strides = array<i32>} : memref<1x32x256xf32, #tpu.memory_space<vmem>>, vector<1x32x256xf32>,
    return
  }
  func.func @transform_0(%arg0: i32) -> (i32, i32, i32) {
    %c0_i32 = arith.constant 0 : i32
    %c0_i32_0 = arith.constant 0 : i32
    %c0_i32_1 = arith.constant 0 : i32
    return %arg0, %c0_i32, %c0_i32_0 : i32, i32, i32
  }
  func.func @transform_1(%arg0: i32) -> (i32, i32) {
    %c0_i32 = arith.constant 0 : i32
    %c0_i32_0 = arith.constant 0 : i32
    %c0_i32_1 = arith.constant 0 : i32
    return %c0_i32, %c0_i32_0 : i32, i32
  }
  func.func @transform_2(%arg0: i32) -> (i32, i32) {
    %c0_i32 = arith.constant 0 : i32
    %c0_i32_0 = arith.constant 0 : i32
    %c0_i32_1 = arith.constant 0 : i32
    return %c0_i32, %c0_i32_0 : i32, i32
  }
  func.func @transform_3(%arg0: i32) -> (i32, i32) {
    %c0_i32 = arith.constant 0 : i32
    %c0_i32_0 = arith.constant 0 : i32
    %c0_i32_1 = arith.constant 0 : i32
    return %c0_i32, %c0_i32_0 : i32, i32
  }
  func.func @transform_4(%arg0: i32) -> (i32, i32) {
    %c0_i32 = arith.constant 0 : i32
    %c0_i32_0 = arith.constant 0 : i32
    %c0_i32_1 = arith.constant 0 : i32
    return %c0_i32, %c0_i32_0 : i32, i32
  }
  func.func @transform_5(%arg0: i32) -> (i32, i32) {
    %c0_i32 = arith.constant 0 : i32
    %c0_i32_0 = arith.constant 0 : i32
    %c0_i32_1 = arith.constant 0 : i32
    return %c0_i32, %c0_i32_0 : i32, i32
  }
  func.func @transform_6(%arg0: i32) -> (i32, i32) {
    %c0_i32 = arith.constant 0 : i32
    %c0_i32_0 = arith.constant 0 : i32
    %c0_i32_1 = arith.constant 0 : i32
    return %c0_i32, %c0_i32_0 : i32, i32
  }
  func.func @transform_7(%arg0: i32) -> (i32, i32) {
    %c0_i32 = arith.constant 0 : i32
    %c0_i32_0 = arith.constant 0 : i32
    %c0_i32_1 = arith.constant 0 : i32
    return %c0_i32, %c0_i32_0 : i32, i32
  }
  func.func @transform_8(%arg0: i32) -> (i32, i32, i32) {
    %c0_i32 = arith.constant 0 : i32
    %c0_i32_0 = arith.constant 0 : i32
    %c0_i32_1 = arith.constant 0 : i32
    return %arg0, %c0_i32, %c0_i32_0 : i32, i32, i32
  }
}

</mosaic_0001>

<bundles_post_ra>
// kernel: tpu_custom_call.1
= control target key start
LH: loop header
LB: loop body
LE: loop exit
PB: predicated region body
PF: predicated region fallthrough
CT: control target
= control target key end

     0   :  { %13 = vsyncpa [#allocation4], 0  ;;  %s1635_s0 = inlined_call_operand.hbm [shape: f32[2,32,256], index: 0, kind: input, shape index: {}]   ;;  %s1636_s1 = inlined_call_operand.vmem [shape: f32[8,32], index: 1, kind: input, shape index: {}]   ;;  %s1637_s2 = inlined_call_operand.vmem [shape: f32[8,1], index: 2, kind: input, shape index: {}]   ;;  %s1638_s3 = inlined_call_operand.vmem [shape: f32[8,72], index: 3, kind: input, shape index: {}]   ;;  %s1639_s4 = inlined_call_operand.vmem [shape: f32[8,1], index: 4, kind: input, shape index: {}]   ;;  %s1640_s5 = inlined_call_operand.vmem [shape: f32[32,8], index: 5, kind: input, shape index: {}]   ;;  %s1641_s6 = inlined_call_operand.vmem [shape: f32[32,1], index: 6, kind: input, shape index: {}]   ;;  %s1642_s7 = inlined_call_operand.vmem [shape: f32[8,256], index: 7, kind: input, shape index: {}]   ;;  %s1643_s8 = inlined_call_operand.hbm [shape: f32[2,32,256], index: 8, kind: output, shape index: {}]  }
   0x1   :  { %15 = vsyncpa [#allocation4 + $0x1], 0 }
   0x2   :  { %16 = vsyncpa [#allocation5], 0 }
   0x3   :  { %18 = vsyncpa [#allocation5 + $0x1], 0  ;;  %s1313_s27 = smov 0   ;;  %s1315_s28 = smov 0  }
   0x4   :  { %s1317_s29 = smov 0   ;;  %s1319_s30 = smov 0  }
   0x5 LB: > { %s1334_s9 = sadd.s32 4294967295, %s1249_s30   ;;  %s1070_s10 = sadd.s32 4294967294, %s1249_s30   ;;  %s1249_s30 = sphi %s1319_s30, %s1662_s30   ;;  %s1245_s29 = sphi %s1317_s29, %s1661_s29   ;;  %s1241_s28 = sphi %s1315_s28, %s1660_s28   ;;  %s1237_s27 = sphi %s1313_s27, %s1659_s27  }
   0x6   : > { %s1338_s11 = sadd.s32 1, %s1249_s30   ;;  %s31_s12 = sadd.s32 1, %s1245_s29 }
   0x7   : > { %s28_s13 = ssub.s32 %s1249_s30, %s1338_s11  ;;  %p38_p0 = scmp.ne.s32.totalorder %s1245_s29, %s1241_s28 }
   0x8   : > { %p29_p1 = scmp.eq.s32.totalorder %s28_s13, 0  ;;  %p39_p2 = scmp.eq.s32.totalorder %s1249_s30, 0 }
   0x9   : > { %p44_p3 = scmp.ne.s32.totalorder %s1241_s28, %s1237_s27  ;;  %p45_p4 = scmp.eq.s32.totalorder %s1334_s9, 0 }
   0xa   : > { %s1350_s14 = scalar_select %p29_p1, %s1245_s29, %s31_s12  }
   0xb   : > { %p1352_p5 = por %p39_p2, %p38_p0  ;;  %p1356_p6 = por %p45_p4, %p44_p3 }
   0xc   : > { %1647 = sst [smem:[#allocation9_spill]] %s1350_s14  ;;  %p215_p7 = scmp.eq.s32.totalorder %s1334_s9, 1 }
   0xd   : > { %s1649_s16 = scalar_select %p1356_p6, 1, 0 }
   0xe   : > { %p221_p8 = scmp.eq.s32.totalorder %s1070_s10, 1  ;;  %p1106_p10 = scmp.lt.s32.totalorder %s1249_s30, 2 }
   0xf   : > { %p1363_p11 = por %p215_p7, %p38_p0  ;;  %s262_s19 = sand.u32 1, %s1245_s29  }
  0x10   : > { %p1367_p12 = por %p221_p8, %p44_p3  ;;  %s1092_s20 = sshll.u32 %s1249_s30, 10 }
  0x11   : > { %s1650_s17 = scalar_select %p1363_p11, 1, 0 }
  0x12   : > { %s1651_s18 = scalar_select %p1367_p12, 1, 0 }
  0x13   : > { %s1073_s21 = sshll.u32 %s262_s19, 6  ;;  %s1376_s24 = scalar_lea.hbm %s1635_s0, %s1092_s20 }
  0x14   : > { %s266_s25 = scalar_lea.vmem [#allocation3], %s1073_s21  ;;  %p1380_p13 = pnand %p1106_p10, %p1352_p5 }
  0x15   : > { %s273_s26 = sshll.u32 %s266_s25, 4  ;;  %s1386_s12 = scalar_lea.sflag [#allocation4], %s262_s19  ;;  %s1384_s26 = int_to_ptr.vmem [resolvable:$true] %s273_s26 }
  0x16   : > { %s1157_s13 = scalar_lea.hbm %s1376_s24, 1024  ;;  %p1159_p1 = pneg %p1380_p13 }
  0x17   : > { %p1158_p0 = scmp.ne.s32.totalorder %s1376_s24, %s1157_s13  ;;  %s1162_s21 = scalar_lea.hbm %s1635_s0, 2048 }
  0x18   : > { %p1163_p4 = scmp.lt.s32.totalorder %s1376_s24, %s1635_s0  ;;  %p1164_p5 = scmp.lt.s32.totalorder %s1162_s21, %s1157_s13 }
  0x19   : > { %p1160_p2 = pnand %p1159_p1, %p1158_p0 }
  0x1a   : > { %p1165_p7 = por %p1164_p5, %p1163_p4 }
  0x1b   : > { %p1161_p3 = pneg %p1160_p2 }
  0x1d   : > { %p1166_p8 = pnand %p1165_p7, %p1161_p3 }
  0x1f   : > { %1169 = shalt.err (!%p1166_p8)
}
  0x20   : > { %s1170_s19 = scalar_lea.vmem %s1384_s26, 1024  ;;  %s1251_s25 = smov [#allocation3]  }
  0x21   : > { %p1171_p10 = scmp.ne.s32.totalorder %s1384_s26, %s1170_s19  ;;  %s1175_s14 = sshll.u32 %s1251_s25, 4  ;;  %s1176_s14 = int_to_ptr.vmem [resolvable:$false] %s1175_s14 }
  0x22   : > { %s1177_s20 = scalar_lea.vmem %s1176_s14, 2048  ;;  %p1178_p2 = scmp.lt.s32.totalorder %s1384_s26, %s1176_s14 }
  0x23   : > { %p1173_p9 = pnand %p1171_p10, %p1159_p1  ;;  %p1179_p12 = scmp.lt.s32.totalorder %s1177_s20, %s1170_s19 }
  0x25   : > { %p1174_p0 = pneg %p1173_p9  ;;  %p1180_p11 = por %p1179_p12, %p1178_p2 }
  0x27   : > { %p1181_p6 = pnand %p1180_p11, %p1174_p0 }
  0x29   : > { %1184 = shalt.err (!%p1181_p6)
}
  0x2a   : > { %s1252_s13 = smov 256   ;;  %s1253_s22 = smov 16  }
  0x2b   : > { %1101 = dma.hbm_to_vmem [thread:$0]  (!%p1380_p13), %s1376_s24, 1024, %s1384_s26, %s1386_s12, %s1252_s13, %s1252_s13, %s1253_s22  }
  0x2c   : > { %p1076_p9 = scmp.ge.s32.totalorder %s1249_s30, 1  ;;  %p281_p1 = scmp.lt.s32.totalorder %s1249_s30, 3 }
  0x2e   : > { %p282_p3 = pnand %p1076_p9, %p281_p1 }
  0x2f   : > { %s1410_s14 = sand.u32 (!%p282_p3), 1, %s1241_s28   ;;  %p1653_p6 = scmp.ne.s32.totalorder (!%p282_p3), %s1649_s16, 0 }
  0x30   : > { %285 = sbr.rel (%p282_p3) target bundleno = 844 (0x34c), region = 52  ;;  %s1077_s21 = sshll.u32 (!%p282_p3), %s1410_s14, 6 }
  0x31   : > { %s288_s15 = scalar_lea.sflag (!%p282_p3), [#allocation4], %s1410_s14  ;;  %s291_s23 = scalar_lea.vmem (!%p282_p3), [#allocation3], %s1077_s21 }
  0x35   : > { %1228 = dma.done.wait (%p1653_p6), %s288_s15, 1024  }
  0x36   : > { %1230 = vsyncadd (%p1653_p6), %s288_s15, 4294966272  ;;  %v1254_v0 = vmov 0.0   ;;  %v1255_v1 = vmov 0   ;;  %v1422_v2 = vld [vmem:[%s291_s23 + $0x38] sm:$0xff]  ;;  %v1424_v3 = vld [vmem:[%s291_s23 + $0x30] sm:$0xff]  ;;  %vm339_vm0 = vcmask 261120   ;;  %v423_v29 = vlaneseq }
  0x37   : > { %407 = vmatprep.mubr.f32.mxu1 %v1254_v0  ;;  %1155 = vset.pattern.permute.xlu0 %v1255_v1  ;;  %v1426_v4 = vld [vmem:[%s291_s23 + $0x28] sm:$0xff]  ;;  %v1429_v5 = vld [vmem:[%s291_s23 + $0x20] sm:$0xff]  ;;  %v1432_v6 = vld [vmem:[%s291_s23 + $0x18] sm:$0xff]  ;;  %s1256_s12 = smov 15   ;;  %s1257_s19 = smov 1   ;;  %vm582_vm1 = vcmask 64512  }
  0x38   : > { %650 = vmatprep.mubr.f32.mxu0 %v1254_v0  ;;  %1156 = vset.pattern.permute.xlu1 %v1255_v1  ;;  %v1435_v7 = vld [vmem:[%s291_s23 + $0x10] sm:$0xff]  ;;  %v333_v8 = vld [vmem:[%s1637_s2] sm:$0xff]  ;;  %v1441_v9 = vld [vmem:[%s291_s23 + $0x8] sm:$0xff]  ;;  %s1646_s25 = smov 16   ;;  %s1259_s20 = smov 113   ;;  %v1478_v31 = vshrl.u32 %v423_v29, 7 }
  0x39   : > { %367 = vmatprep.subr.mxu1 %v1422_v2  ;;  %336 = vperm.xlu0 %1155, %v333_v8   ;;  %v1444_v10 = vld [vmem:[%s291_s23] sm:$0xff]  ;;  %s1260_s13 = smov 17   ;;  %s1261_s22 = smov 111   ;;  %v836_v22 = vld [vmem:[%s1641_s6 + $0x10] sm:$0xff]  ;;  %v835_v23 = vld [vmem:[%s1641_s6 + $0x8] sm:$0xff]  ;;  %v1480_v33 = vand.u32 127, %v423_v29 }
  0x3a   : > { %368 = vmatpush1.msra.mxu1 %v1424_v3  ;;  %v332_v11 = vld [vmem:[%s1636_s1] sm:$0xff]  ;;  %s1262_s16 = smov 112   ;;  %s1263_s24 = smov 120   ;;  %v837_v24 = vld [vmem:[%s1641_s6 + $0x18] sm:$0xff]  ;;  %v487_v34 = vsub.s32 3, %v1478_v31  ;;  %v468_v35 = vsub.s32 2, %v1478_v31 }
  0x3b   : > { %369 = vmatprep.subr.mxu1 %v1426_v4  ;;  %v497_v19 = vld [vmem:[%s1638_s3] sm:$0xff]  ;;  %s1264_s26 = smov 127   ;;  %s1265_s10 = smov 88   ;;  %v449_v37 = vsub.s32 1, %v1478_v31  ;;  %v1493_v40 = vld [vmem:[%s1642_s7 + $0x8] sm:$0xff]  ;;  %vm463_vm2 = vcmp.lt.s32.totalorder %v1480_v33, 15 }
  0x3c   : > { %370 = vmatpush1.msra.mxu1 %v1429_v5  ;;  %v834_v20 = vld [vmem:[%s1641_s6] sm:$0xff]  ;;  %vm482_vm3 = vcmp.lt.s32.totalorder %v1480_v33, 1  ;;  %v492_v42 = vrot.slane %v1493_v40, %v487_v34  ;;  %v430_v43 = vsub.s32 0, %v1478_v31  ;;  %v473_v45 = vrot.slane %v1493_v40, %v468_v35  ;;  %s984_s23 = scalar_lea.sflag [#allocation5], %s1410_s14  ;;  %p1654_p12 = scmp.ne.s32.totalorder %s1650_s17, 0 }
  0x3d   : > { %371 = vmatprep.subr.mxu1 %v1432_v6  ;;  %v820_v21 = vld [vmem:[%s1639_s4] sm:$0xff]  ;;  %vm444_vm4 = vcmp.lt.s32.totalorder %v1480_v33, 16  ;;  %v454_v46 = vrot.slane %v1493_v40, %v449_v37  ;;  %vm425_vm5 = vcmp.lt.s32.totalorder %v1480_v33, 17  ;;  %v723_v55 = vsub.s32 7, %v1478_v31 }
  0x3e   : > { %372 = vmatpush1.msra.mxu1 %v1435_v7  ;;  %v1488_v39 = vld [vmem:[%s1642_s7] sm:$0xff]  ;;  %v435_v58 = vrot.slane %v1493_v40, %v430_v43  ;;  %vm718_vm6 = vcmp.lt.s32.totalorder %v1480_v33, 111  ;;  %v704_v63 = vsub.s32 6, %v1478_v31  ;;  %vm699_vm7 = vcmp.lt.s32.totalorder %v1480_v33, 112 }
  0x3f   : > { %373 = vmatprep.subr.mxu1 %v1441_v9  ;;  %v488_v41 = vrot.slane %v1488_v39, %v487_v34  ;;  %v469_v44 = vrot.slane %v1488_v39, %v468_v35  ;;  %v450_v56 = vrot.slane %v1488_v39, %v449_v37  ;;  %v431_v8 = vrot.slane %v1488_v39, %v430_v43 }
  0x40   : > { %374 = vmatpush1.msra.mxu1 %v1444_v10  ;;  %vm680_vm8 = vcmp.lt.s32.totalorder %v1480_v33, 113  ;;  %v666_v34 = vsub.s32 4, %v1478_v31  ;;  %vm661_vm9 = vcmp.lt.s32.totalorder %v1480_v33, 127 }
  0x41   : > { %1079 = vmatmul.mubr.msk.f32.vlgmr.msra.gmra.mxu1 %vm339_vm0, %v332_v11 }
  0x42   : > { %575 = vmatprep.mubr.f32.mxu1 %v1254_v0 }
  0xb4   : > { %v337_v12 = vpop.permute.xlu0 %336 }
 0x101   : > { %v409_v13 = vpop.f32.mrf.mxu1 }
 0x102   : > { %v410_v14 = vadd.f32 %v409_v13, %v337_v12 }
 0x103   : > { %v411_v15 = vpop.f32.mrf.mxu1 }
 0x104   : > { %v414_v16 = vmax.f32 %v410_v14, 0.0  ;;  %v412_v17 = vadd.f32 %v411_v15, %v337_v12  ;;  %v685_v12 = vsub.s32 5, %v1478_v31  ;;  %v728_v15 = vrot.slane %v1493_v40, %v723_v55 }
 0x105   : > { %v667_v31 = vrot.slane %v1488_v39, %v666_v34 }
 0x106   : > { %v415_v18 = vmax.f32 %v412_v17, 0.0  ;;  %459 = vrot.lane.b32.xlu1 %v414_v16, %s1256_s12  ;;  %478 = vrot.lane.b32.xlu0 %v414_v16, %s1257_s19  ;;  %v724_v17 = vrot.slane %v1488_v39, %v723_v55 }
 0x108   : > { %616 = vmatprep.subr.mxu0 %v415_v18 }
 0x109   : > { %617 = vmatpush1.msra.mxu0 %v414_v16 }
 0x10a   : > { %440 = vrot.lane.b32.xlu1 %v414_v16, %s1646_s25  ;;  %676 = vrot.lane.b32.xlu0 %v414_v16, %s1259_s20 }
 0x10b   : > { %1081 = vmatmul.mubr.msk.f32.vlgmr.msra.gmra.mxu0 %vm582_vm1, %v497_v19 }
 0x10c   : > { %934 = vmatprep.mubr.f32.mxu0 %v1254_v0 }
 0x10e   : > { %419 = vrot.lane.b32.xlu1 %v414_v16, %s1260_s13  ;;  %461 = vrot.lane.b32.xlu0 %v415_v18, %s1256_s12 }
 0x112   : > { %714 = vrot.lane.b32.xlu1 %v414_v16, %s1261_s22  ;;  %442 = vrot.lane.b32.xlu0 %v415_v18, %s1646_s25  ;;  %s1568_s25 = scalar_lea.vmem [#allocation6], %s1077_s21 }
 0x113   : > { %s997_s21 = sshll.u32 %s1568_s25, 4  ;;  %s1584_s21 = int_to_ptr.vmem [resolvable:$true] %s997_s21 }
 0x116   : > { %480 = vrot.lane.b32.xlu1 %v415_v18, %s1257_s19  ;;  %421 = vrot.lane.b32.xlu0 %v415_v18, %s1260_s13  ;;  %s1185_s19 = scalar_lea.vmem %s1584_s21, 1024 }
 0x117   : > { %p1186_p11 = scmp.ne.s32.totalorder %s1584_s21, %s1185_s19 }
 0x119   : > { %p1187_p13 = pnand %p1186_p11, %p1654_p12 }
 0x11a   : > { %695 = vrot.lane.b32.xlu1 %v414_v16, %s1262_s16  ;;  %716 = vrot.lane.b32.xlu0 %v415_v18, %s1261_s22 }
 0x11b   : > { %p1188_p4 = pneg %p1187_p13 }
 0x11e   : > { %507 = vrot.lane.b32.xlu1 %v497_v19, %s1263_s24  ;;  %697 = vrot.lane.b32.xlu0 %v415_v18, %s1262_s16 }
 0x122   : > { %678 = vrot.lane.b32.xlu1 %v415_v18, %s1259_s20  ;;  %657 = vrot.lane.b32.xlu0 %v414_v16, %s1264_s26 }
 0x126   : > { %659 = vrot.lane.b32.xlu1 %v415_v18, %s1264_s26  ;;  %743 = vrot.lane.b32.xlu0 %v497_v19, %s1265_s10  ;;  %s1093_s26 = sshll.u32 %s1334_s9, 10  ;;  %s1266_s9 = smov [#allocation6]  }
 0x127   : > { %s1590_s15 = scalar_lea.hbm %s1643_s8, %s1093_s26  ;;  %s1189_s13 = sshll.u32 %s1266_s9, 4  ;;  %s1190_s13 = int_to_ptr.vmem [resolvable:$false] %s1189_s13 }
 0x128   : > { %s1191_s20 = scalar_lea.vmem %s1190_s13, 2048  ;;  %p1192_p5 = scmp.lt.s32.totalorder %s1584_s21, %s1190_s13 }
 0x129   : > { %p1193_p7 = scmp.lt.s32.totalorder %s1191_s20, %s1185_s19 }
 0x12a   : > { %840 = vperm.xlu0 %1155, %v834_v20   ;;  %823 = vperm.xlu1 %1156, %v820_v21  }
 0x12b   : > { %p1194_p8 = por %p1193_p7, %p1192_p5 }
 0x12d   : > { %p1195_p10 = pnand %p1194_p8, %p1188_p4 }
 0x12e   : > { %850 = vperm.xlu0 %1155, %v836_v22   ;;  %845 = vperm.xlu1 %1156, %v835_v23   ;;  %v705_v22 = vrot.slane %v1488_v39, %v704_v63  ;;  %v709_v23 = vrot.slane %v1493_v40, %v704_v63 }
 0x132   : > { %855 = vperm.xlu1 %1156, %v837_v24  }
 0x178   : > { %v460_v25 = vpop.permute.xlu1 %459  ;;  %v479_v26 = vpop.permute.xlu0 %478 }
 0x17c   : > { %v441_v27 = vpop.permute.xlu1 %440  ;;  %v1476_v28 = vpop.permute.xlu0 %676 }
 0x180   : > { %v420_v30 = vpop.permute.xlu1 %419  ;;  %v462_v32 = vpop.permute.xlu0 %461 }
 0x181   : > { %v464_v49 = vsel %vm463_vm2, %v460_v25, %v462_v32  ;;  %v465_v52 = vsel %vm463_vm2, %v462_v32, %v460_v25  ;;  %v690_v32 = vrot.slane %v1493_v40, %v685_v12 }
 0x182   : > { %v475_v59 = vmul.f32 %v473_v45, %v464_v49  ;;  %v474_v1 = vmul.f32 %v469_v44, %v465_v52  ;;  %v671_v45 = vrot.slane %v1493_v40, %v666_v34 }
 0x184   : > { %v715_v36 = vpop.permute.xlu1 %714  ;;  %v443_v38 = vpop.permute.xlu0 %442 }
 0x185   : > { %v445_v57 = vsel %vm444_vm4, %v441_v27, %v443_v38  ;;  %v446_v60 = vsel %vm444_vm4, %v443_v38, %v441_v27  ;;  %v686_v27 = vrot.slane %v1488_v39, %v685_v12  ;;  %v833_v12 = vld [vmem:[%s1640_s5 + $0x18] sm:$0xff] }
 0x186   : > { %v456_v13 = vmul.f32 %v454_v46, %v445_v57  ;;  %v455_v16 = vmul.f32 %v450_v56, %v446_v60 }
 0x188   : > { %v481_v47 = vpop.permute.xlu1 %480  ;;  %v422_v48 = vpop.permute.xlu0 %421 }
 0x189   : > { %v483_v50 = vsel %vm482_vm3, %v479_v26, %v481_v47  ;;  %v484_v51 = vsel %vm482_vm3, %v481_v47, %v479_v26  ;;  %v426_v11 = vsel %vm425_vm5, %v420_v30, %v422_v48  ;;  %v427_v14 = vsel %vm425_vm5, %v422_v48, %v420_v30 }
 0x18a   : > { %v493_v53 = vmul.f32 %v488_v41, %v484_v51  ;;  %v494_v54 = vmul.f32 %v492_v42, %v483_v50  ;;  %v437_v19 = vmul.f32 %v435_v58, %v426_v11  ;;  %v436_v25 = vmul.f32 %v431_v8, %v427_v14  ;;  %v831_v8 = vld [vmem:[%s1640_s5 + $0x8] sm:$0xff]  ;;  %v832_v11 = vld [vmem:[%s1640_s5 + $0x10] sm:$0xff] }
 0x18c   : > { %v696_v61 = vpop.permute.xlu1 %695  ;;  %535 = vmatprep.subr.mxu1 %v494_v54  ;;  %v717_v62 = vpop.permute.xlu0 %716 }
 0x18d   : > { %536 = vmatpush1.msra.mxu1 %v493_v53  ;;  %v720_v18 = vsel %vm718_vm6, %v717_v62, %v715_v36  ;;  %v719_v20 = vsel %vm718_vm6, %v715_v36, %v717_v62 }
 0x18e   : > { %537 = vmatprep.subr.mxu1 %v475_v59  ;;  %v730_v29 = vmul.f32 %v728_v15, %v720_v18  ;;  %v729_v35 = vmul.f32 %v724_v17, %v719_v20 }
 0x18f   : > { %538 = vmatpush1.msra.mxu1 %v474_v1  ;;  %v830_v1 = vld [vmem:[%s1640_s5] sm:$0xff] }
 0x190   : > { %v508_v21 = vpop.permute.xlu1 %507  ;;  %539 = vmatprep.subr.mxu1 %v456_v13  ;;  %v698_v24 = vpop.permute.xlu0 %697 }
 0x191   : > { %v701_v26 = vsel %vm699_vm7, %v698_v24, %v696_v61  ;;  %540 = vmatpush1.msra.mxu1 %v455_v16  ;;  %v700_v30 = vsel %vm699_vm7, %v696_v61, %v698_v24 }
 0x192   : > { %541 = vmatprep.subr.mxu1 %v437_v19  ;;  %v711_v36 = vmul.f32 %v709_v23, %v701_v26  ;;  %v710_v38 = vmul.f32 %v705_v22, %v700_v30 }
 0x193   : > { %542 = vmatpush1.msra.mxu1 %v436_v25 }
 0x194   : > { %v679_v37 = vpop.permute.xlu1 %678  ;;  %1080 = vmatmul.mubr.msk.f32.vlgmr.msra.gmra.mxu1 %vm339_vm0, %v508_v21  ;;  %771 = vmatprep.subr.mxu1 %v730_v29  ;;  %v658_v46 = vpop.permute.xlu0 %657 }
 0x195   : > { %v681_v41 = vsel %vm680_vm8, %v1476_v28, %v679_v37  ;;  %v682_v42 = vsel %vm680_vm8, %v679_v37, %v1476_v28  ;;  %772 = vmatpush1.msra.mxu1 %v729_v35  ;;  %811 = vmatprep.mubr.f32.mxu1 %v1254_v0 }
 0x196   : > { %v691_v43 = vmul.f32 %v686_v27, %v681_v41  ;;  %v692_v44 = vmul.f32 %v690_v32, %v682_v42  ;;  %773 = vmatprep.subr.mxu1 %v711_v36 }
 0x197   : > { %774 = vmatpush1.msra.mxu1 %v710_v38 }
 0x198   : > { %v660_v47 = vpop.permute.xlu1 %659  ;;  %775 = vmatprep.subr.mxu1 %v692_v44  ;;  %v744_v51 = vpop.permute.xlu0 %743 }
 0x199   : > { %v662_v48 = vsel %vm661_vm9, %v658_v46, %v660_v47  ;;  %v663_v49 = vsel %vm661_vm9, %v660_v47, %v658_v46  ;;  %776 = vmatpush1.msra.mxu1 %v691_v43 }
 0x19a   : > { %v672_v28 = vmul.f32 %v667_v31, %v662_v48  ;;  %v673_v50 = vmul.f32 %v671_v45, %v663_v49 }
 0x19c   : > { %777 = vmatprep.subr.mxu1 %v673_v50 }
 0x19d   : > { %778 = vmatpush1.msra.mxu1 %v672_v28 }
 0x19e   : > { %1082 = vmatmul.mubr.msk.f32.vlgmr.msra.gmra.mxu1 %vm339_vm0, %v744_v51 }
 0x1a5   : > { %v824_v58 = vpop.permute.xlu1 %823  ;;  %v841_v13 = vpop.permute.xlu0 %840 }
 0x1a9   : > { %v846_v19 = vpop.permute.xlu1 %845  ;;  %v851_v26 = vpop.permute.xlu0 %850 }
 0x1ad   : > { %v856_v37 = vpop.permute.xlu1 %855 }
 0x1cb   : > { %v652_v52 = vpop.f32.mrf.mxu0 }
 0x1cd   : > { %v654_v39 = vpop.f32.mrf.mxu0 }
 0x254   : > { %v577_v33 = vpop.f32.mrf.mxu1 }
 0x255   : > { %v653_v54 = vadd.f32 %v652_v52, %v577_v33 }
 0x256   : > { %v579_v53 = vpop.f32.mrf.mxu1 }
 0x257   : > { %v655_v55 = vadd.f32 %v654_v39, %v579_v53 }
 0x25e   : > { %v813_v40 = vpop.f32.mrf.mxu1 }
 0x25f   : > { %v818_v56 = vadd.f32 %v813_v40, %v653_v54 }
 0x260   : > { %v815_v57 = vpop.f32.mrf.mxu1 }
 0x261   : > { %v819_v59 = vadd.f32 %v815_v57, %v655_v55  ;;  %v826_v60 = vadd.f32 %v824_v58, %v818_v56 }
 0x263   : > { %v827_v61 = vadd.f32 %v824_v58, %v819_v59  ;;  %v828_v63 = vmax.f32 %v826_v60, 0.0 }
 0x265   : > { %v829_v62 = vmax.f32 %v827_v61, 0.0 }
 0x267   : > { %900 = vmatprep.subr.mxu0 %v829_v62 }
 0x268   : > { %901 = vmatpush1.msra.mxu0 %v828_v63 }
 0x269   : > { %1083 = vmatmul.mubr.msk.f32.vlgmr.msra.gmra.mxu0 %vm582_vm1, %v830_v1 }
 0x26a   : > { %940 = vmatprep.mubr.f32.mxu0 %v1254_v0 }
 0x26d   : > { %1084 = vmatmul.mubr.msk.f32.gmra.mxu0 %vm582_vm1, %v831_v8 }
 0x26e   : > { %946 = vmatprep.mubr.f32.mxu0 %v1254_v0 }
 0x271   : > { %1085 = vmatmul.mubr.msk.f32.gmra.mxu0 %vm582_vm1, %v832_v11 }
 0x272   : > { %952 = vmatprep.mubr.f32.mxu0 %v1254_v0 }
 0x275   : > { %1086 = vmatmul.mubr.msk.f32.gmra.mxu0 %vm582_vm1, %v833_v12 }
 0x329   : > { %v936_v14 = vpop.f32.mrf.mxu0 }
 0x32a   : > { %v937_v15 = vadd.f32 %v936_v14, %v841_v13 }
 0x32b   : > { %v938_v16 = vpop.f32.mrf.mxu0 }
 0x32c   : > { %v959_v17 = vadd.f32 %v937_v15, %v1444_v10  ;;  %v939_v18 = vadd.f32 %v938_v16, %v841_v13 }
 0x32d   : > { %v942_v20 = vpop.f32.mrf.mxu0 }
 0x32e   : > { %v967_v21 = vmax.f32 %v959_v17, 0.0  ;;  %v960_v22 = vadd.f32 %v939_v18, %v1441_v9  ;;  %v943_v23 = vadd.f32 %v942_v20, %v846_v19 }
 0x32f   : > { %v944_v0 = vpop.f32.mrf.mxu0 }
 0x330   : > { %975 = vst [vmem:[%s1568_s25] sm:$0xff] %v967_v21  ;;  %v968_v24 = vmax.f32 %v960_v22, 0.0  ;;  %v961_v25 = vadd.f32 %v943_v23, %v1435_v7  ;;  %v945_v10 = vadd.f32 %v944_v0, %v846_v19 }
 0x331   : > { %v948_v27 = vpop.f32.mrf.mxu0 }
 0x332   : > { %976 = vst [vmem:[%s1568_s25 + $0x8] sm:$0xff] %v968_v24  ;;  %v969_v29 = vmax.f32 %v961_v25, 0.0  ;;  %v962_v9 = vadd.f32 %v945_v10, %v1432_v6  ;;  %v949_v30 = vadd.f32 %v948_v27, %v851_v26 }
 0x333   : > { %v950_v32 = vpop.f32.mrf.mxu0 }
 0x334   : > { %977 = vst [vmem:[%s1568_s25 + $0x10] sm:$0xff] %v969_v29  ;;  %v970_v34 = vmax.f32 %v962_v9, 0.0  ;;  %v963_v35 = vadd.f32 %v949_v30, %v1429_v5  ;;  %v951_v36 = vadd.f32 %v950_v32, %v851_v26 }
 0x335   : > { %v954_v7 = vpop.f32.mrf.mxu0 }
 0x336   : > { %978 = vst [vmem:[%s1568_s25 + $0x18] sm:$0xff] %v970_v34  ;;  %v971_v38 = vmax.f32 %v963_v35, 0.0  ;;  %v964_v41 = vadd.f32 %v951_v36, %v1426_v4  ;;  %v955_v42 = vadd.f32 %v954_v7, %v856_v37 }
 0x337   : > { %v956_v6 = vpop.f32.mrf.mxu0 }
 0x338   : > { %979 = vst [vmem:[%s1568_s25 + $0x20] sm:$0xff] %v971_v38  ;;  %v972_v43 = vmax.f32 %v964_v41, 0.0  ;;  %v965_v44 = vadd.f32 %v955_v42, %v1424_v3  ;;  %v957_v31 = vadd.f32 %v956_v6, %v856_v37 }
 0x33a   : > { %980 = vst [vmem:[%s1568_s25 + $0x28] sm:$0xff] %v972_v43  ;;  %v973_v5 = vmax.f32 %v965_v44, 0.0  ;;  %v966_v45 = vadd.f32 %v957_v31, %v1422_v2 }
 0x33c   : > { %981 = vst [vmem:[%s1568_s25 + $0x30] sm:$0xff] %v973_v5  ;;  %v974_v4 = vmax.f32 %v966_v45, 0.0 }
 0x33e   : > { %982 = vst [vmem:[%s1568_s25 + $0x38] sm:$0xff] %v974_v4 }
 0x33f   : > { %1198 = shalt.err (!%p1195_p10)
}
 0x340   : > { %s1199_s22 = scalar_lea.hbm %s1590_s15, 1024  ;;  %s1203_s25 = scalar_lea.hbm %s1643_s8, 2048 }
 0x341   : > { %p1200_p0 = scmp.ne.s32.totalorder %s1590_s15, %s1199_s22  ;;  %p1204_p1 = scmp.lt.s32.totalorder %s1590_s15, %s1643_s8 }
 0x342   : > { %p1205_p3 = scmp.lt.s32.totalorder %s1203_s25, %s1199_s22 }
 0x343   : > { %p1201_p2 = pnand %p1200_p0, %p1654_p12 }
 0x344   : > { %p1206_p6 = por %p1205_p3, %p1204_p1 }
 0x345   : > { %p1202_p9 = pneg %p1201_p2 }
 0x347   : > { %p1207_p11 = pnand %p1206_p6, %p1202_p9 }
 0x349   : > { %1210 = shalt.err (!%p1207_p11)
}
 0x34a   : > { %s1267_s12 = smov 256   ;;  %s1655_s19 = smov 16  }
 0x34b   : > { %1096 = dma.vmem_to_hbm [thread:$0]  (%p1654_p12), %s1584_s21, 1024, %s1590_s15, %s984_s23, %s1267_s12, %s1267_s12, %s1655_s19  }
 0x34c PF: > { %s1012_s9 = sand.u32 1, %s1237_s27   ;;  %p1656_p13 = scmp.ne.s32.totalorder %s1651_s18, 0 }
 0x34d   : > { %p1657_p4 = scmp.ge.s32.totalorder %s1249_s30, 2  ;;  %s1013_s13 = scalar_lea.sflag [#allocation5], %s1012_s9 }
 0x34f   : > { %p1103_p5 = pnand %p1657_p4, %p1656_p13 }
 0x351   : > { %p1104_p7 = pneg %p1103_p5 }
 0x353   : > { %1232 = dma.done.wait (%p1104_p7), %s1013_s13, 1024  }
 0x354   : > { %1234 = vsyncadd (%p1104_p7), %s1013_s13, 4294966272  ;;  %s1658_s17 = sld [smem:[#allocation9_spill]]  ;;  %p21_p8 = scmp.ge.s32.totalorder %s1338_s11, 4  }
 0x355   : > { %s1659_s27 = smov %s1241_s28  ;;  %s1660_s28 = smov %s1245_s29 }
 0x356   : > { %s1662_s30 = smov %s1338_s11  ;;  %23 = sbr.rel (!%p21_p8) target bundleno = 5 (0x5), region = 97 }
 0x35a   : > { %s1661_s29 = smov %s1658_s17 }
 0x35b   :  { %1018 = vsyncpa [#allocation4], 1 }
 0x35c   :  { %1020 = vsyncpa [#allocation4 + $0x1], 1 }
 0x35d   :  { %1021 = vsyncpa [#allocation5], 1 }
 0x35e   :  { %1023 = vsyncpa [#allocation5 + $0x1], 1 }

</bundles_post_ra>
